<compile_context>
chip_gen: v6e
topology: v6e:2x2x1
jax: 0.10.0
libtpu: 0.0.40
codegen_flags: <defaults>
</compile_context>

<pallas_src>
import jax
import jax.numpy as jnp
from jax.experimental import pallas as pl
from jax.experimental.pallas import tpu as pltpu


def _round_up(x, m):
    return ((x + m - 1) // m) * m


def _pad_last(a, target):
    pad = target - a.shape[-1]
    if pad == 0:
        return a
    return jnp.pad(a, [(0, 0)] * (a.ndim - 1) + [(0, pad)])


def _choose_tile_n(N, K, C, Cp, itemsize, max_tile=512, budget_bytes=8 * 1024 * 1024):
    """Largest TN (multiple of 8, divides N, <= max_tile) fitting a VMEM budget."""
    best = None
    tn = 8
    while tn <= min(N, max_tile):
        if N % tn == 0:
            per_tile = (
                2 * (tn * K * 4 + tn * Cp * 4)              # double-buffered idx/out blocks
                + tn * N * itemsize + tn * C * itemsize      # one-hot + gathered rows
                + 3 * tn * Cp * 4                            # h / v / running-max temporaries
            )
            if per_tile <= budget_bytes:
                best = tn
        tn += 8
    return best if best is not None else N  # full-N block is always legal


def edge_conv_kernel(x_ref, idx_ref, w1_ref, wd_ref, b_ref, o_ref):
    # x_ref  : (1, N, C)   full per-batch point features (gather source, VMEM resident)
    # idx_ref: (1, TN, K)  int32 neighbor indices for this N-tile
    # w1_ref : (C, Cp)     conv1 weight (output channels zero-padded to Cp lanes)
    # wd_ref : (C, Cp)     conv2 - conv1 weight (fused central term)
    # b_ref  : (1, Cp)     b1 + b2 (f32)
    # o_ref  : (1, TN, Cp) output tile (f32)
    N = x_ref.shape[1]
    TN, K = idx_ref.shape[1], idx_ref.shape[2]

    n = pl.program_id(1)
    start = n * TN
    if TN % 8 == 0:
        start = pl.multiple_of(start, 8)

    x_full = x_ref[0]                          # (N, C)   gather source
    x_tile = x_ref[0, pl.ds(start, TN), :]     # (TN, C)  central points of this tile
    w1 = w1_ref[...]                           # (C, Cp)

    # Fused central term: x @ (w2 - w1) + (b1 + b2)  -> (TN, Cp), f32 accumulate.
    h = jnp.dot(x_tile, wd_ref[...], preferred_element_type=jnp.float32) + b_ref[...]

    idx_tile = idx_ref[0]                                        # (TN, K) int32
    col_ids = jax.lax.broadcasted_iota(jnp.int32, (TN, N), 1)    # source-row ids

    # Running max over the (small, static) K neighbors — no (TN, K, Cp) temporary.
    acc = None
    for k in range(K):
        onehot = (idx_tile[:, k:k + 1] == col_ids).astype(x_full.dtype)       # (TN, N)
        nb_k = jnp.dot(onehot, x_full,                                        # gather rows
                       preferred_element_type=jnp.float32).astype(w1.dtype)   # (TN, C)
        v = jnp.dot(nb_k, w1, preferred_element_type=jnp.float32) + h         # (TN, Cp)
        acc = v if acc is None else jnp.maximum(acc, v)

    # relu is monotone -> relu(max_k v_k) == max_k relu(v_k)
    # TODO(synk): extra 'd{i}' 1x1 conv layers for n_layer > 1 not implemented
    # (module default n_layer=1, that loop body never runs).
    o_ref[0] = jnp.maximum(acc, 0.0).astype(o_ref.dtype)


def edge_conv_forward(x, idx, params, *, compute_dtype=jnp.float32):
    """x: (B, N, 1, C) f32, idx: (B, N, K) int -> (B, N, 1, Co) f32, Co = C*scale."""
    w1, b1, w2, b2 = params
    B, N, _, C = x.shape
    K = idx.shape[-1]
    Co = w1.shape[1]
    Cp = _round_up(Co, 128)                      # lane-dense output stores

    itemsize = jnp.dtype(compute_dtype).itemsize
    x3 = x[:, :, 0, :].astype(compute_dtype)     # (B, N, C)
    idx = idx.astype(jnp.int32)

    # Algebraic fusion (one-time tiny wrapper ops):
    #   (nb - x)@w1 + b1 + x@w2 + b2 = nb@w1 + x@(w2 - w1) + (b1 + b2)
    w1_p = _pad_last(w1, Cp).astype(compute_dtype)        # (C, Cp)
    wd_p = _pad_last(w2 - w1, Cp).astype(compute_dtype)   # (C, Cp)
    b_p = _pad_last(b1 + b2, Cp).astype(jnp.float32)      # (1, Cp)

    TN = _choose_tile_n(N, K, C, Cp, itemsize)
    grid = (B, N // TN)

    # Explicit scoped-VMEM limit; capped at 48 MiB so a v6e-sized request never
    # overshoots v7x's 64 MiB per-TensorCore VMEM.
    est = (2 * (N * C * itemsize + TN * K * 4 + TN * Cp * 4)
           + 2 * C * Cp * itemsize + Cp * 4
           + TN * N * itemsize + TN * C * itemsize + 3 * TN * Cp * 4)
    vmem_limit = int(min(48 * 1024 * 1024, max(16 * 1024 * 1024, 2 * est)))

    out = pl.pallas_call(
        edge_conv_kernel,
        out_shape=jax.ShapeDtypeStruct((B, N, Cp), jnp.float32),
        grid=grid,
        in_specs=[
            # full batch row: constant over the n axis -> not re-DMA'd per tile
            pl.BlockSpec((1, N, C), lambda b, n: (b, 0, 0)),
            pl.BlockSpec((1, TN, K), lambda b, n: (b, n, 0)),
            # weights / fused bias: constant index map -> stay resident in VMEM
            pl.BlockSpec((C, Cp), lambda b, n: (0, 0)),
            pl.BlockSpec((C, Cp), lambda b, n: (0, 0)),
            pl.BlockSpec((1, Cp), lambda b, n: (0, 0)),
        ],
        out_specs=pl.BlockSpec((1, TN, Cp), lambda b, n: (b, n, 0)),
        compiler_params=pltpu.CompilerParams(
            dimension_semantics=("parallel", "parallel"),
            vmem_limit_bytes=vmem_limit,
        ),
    )(x3, idx, w1_p, wd_p, b_p)

    # drop lane padding; match PyTorch: y.transpose(1,2).unsqueeze(-2) -> (B, N, 1, Co)
    return out[:, :, :Co][:, :, None, :]


def edge_conv_reference(x, idx, params):
    """Pure-JAX reference mirroring the PyTorch forward (unfused, f32)."""
    w1, b1, w2, b2 = params
    x3 = x[:, :, 0, :]
    neighbors = jax.vmap(lambda xb, ib: xb[ib])(x3, idx)             # (B, N, K, C)
    central = x3[:, :, None, :]
    msg = jnp.einsum("bnkc,co->bnko", neighbors - central, w1) + b1  # conv1
    xcen = jnp.einsum("bnc,co->bno", x3, w2) + b2                    # conv2
    ef = jax.nn.relu(xcen[:, :, None, :] + msg)
    y = jnp.max(ef, axis=2)                                          # max over K
    return y[:, :, None, :]


def init_params(key, c_in, scale=2):
    """Deterministic init mimicking PyTorch Conv2d default (uniform ±1/sqrt(fan_in))."""
    co = c_in * scale
    bound = 1.0 / jnp.sqrt(jnp.float32(c_in))
    k1, k2, k3, k4 = jax.random.split(key, 4)
    w1 = jax.random.uniform(k1, (c_in, co), jnp.float32, -bound, bound)
    b1 = jax.random.uniform(k2, (1, co), jnp.float32, -bound, bound)
    w2 = jax.random.uniform(k3, (c_in, co), jnp.float32, -bound, bound)
    b2 = jax.random.uniform(k4, (1, co), jnp.float32, -bound, bound)
    return (w1, b1, w2, b2)


def knn_idx(points, k):
    """Simple knn glue (matches dil_knn with d=1): points (B, N, C) -> (B, N, k)."""
    d2 = jnp.sum((points[:, :, None, :] - points[:, None, :, :]) ** 2, axis=-1)
    return jnp.argsort(d2, axis=-1)[:, :, :k].astype(jnp.int32)


if __name__ == "__main__":
    B, N, C, scale, K = 2, 32, 16, 2, 4   # out_channel=16, scale=2, k=4

    key = jax.random.PRNGKey(0)
    kx, kp = jax.random.split(key)
    x = jax.random.normal(kx, (B, N, 1, C), jnp.float32)
    idx = knn_idx(x[:, :, 0, :], K)
    params = init_params(kp, C, scale)

    y_ref = edge_conv_reference(x, idx, params)

    # f32 path: exact module semantics (modulo the w2-w1 / b1+b2 reassociation).
    y = jax.block_until_ready(edge_conv_forward(x, idx, params))
    assert y.shape == (B, N, 1, C * scale), y.shape
    assert jnp.allclose(y, y_ref, atol=1e-4, rtol=1e-4), "f32 kernel mismatch vs reference"

    # bf16 compute path (f32 accumulation) — recommended on v6e/v7x for HBM/VMEM savings.
    y_bf = jax.block_until_ready(
        edge_conv_forward(x, idx, params, compute_dtype=jnp.bfloat16))
    assert jnp.allclose(y_bf, y_ref, atol=5e-2, rtol=5e-2), "bf16 kernel mismatch vs reference"

    print("KERNEL_OK")
</pallas_src>

<mosaic_0001>
module attributes {stable_mosaic.version = 11 : i64} {
  func.func @edge_conv_kernel(%arg0: i32, %arg1: i32, %arg2: memref<1x32x16xf32, #tpu.memory_space<vmem>>, %arg3: memref<1x32x4xi32, #tpu.memory_space<vmem>>, %arg4: memref<16x128xf32, #tpu.memory_space<vmem>>, %arg5: memref<16x128xf32, #tpu.memory_space<vmem>>, %arg6: memref<1x128xf32, #tpu.memory_space<vmem>>, %arg7: memref<1x32x128xf32, #tpu.memory_space<vmem>>) attributes {dimension_semantics = [#tpu.dimension_semantics<parallel>, #tpu.dimension_semantics<parallel>], iteration_bounds = array<i64: 2, 1>, scalar_prefetch = 0 : i64, scratch_operands = 0 : i64, tpu.core_type = #tpu.core_type<tc>, window_params = [{transform_indices = @transform_0, window_bounds = array<i64: 1, 32, 16>}, {transform_indices = @transform_1, window_bounds = array<i64: 1, 32, 4>}, {pipeline_mode = #tpu.pipeline_mode<synchronous>, transform_indices = @transform_2, window_bounds = array<i64: 16, 128>}, {pipeline_mode = #tpu.pipeline_mode<synchronous>, transform_indices = @transform_3, window_bounds = array<i64: 16, 128>}, {pipeline_mode = #tpu.pipeline_mode<synchronous>, transform_indices = @transform_4, window_bounds = array<i64: 1, 128>}, {transform_indices = @transform_5, window_bounds = array<i64: 1, 32, 128>}]} {
    %c32_i32 = arith.constant 32 : i32
    %0 = arith.muli %arg1, %c32_i32 : i32
    %1 = tpu.assume_multiple %0, 8 : i32
    %c0 = arith.constant 0 : index
    %c0_0 = arith.constant 0 : index
    %c0_1 = arith.constant 0 : index
    %2 = vector.load %arg2[%c0, %c0_0, %c0_1] : memref<1x32x16xf32, #tpu.memory_space<vmem>>, vector<1x32x16xf32>
    %3 = vector.shape_cast %2 : vector<1x32x16xf32> to vector<32x16xf32>
    %c0_2 = arith.constant 0 : index
    %4 = arith.index_cast %1 : i32 to index
    %c0_3 = arith.constant 0 : index
    %5 = vector.load %arg2[%c0_2, %4, %c0_3] : memref<1x32x16xf32, #tpu.memory_space<vmem>>, vector<1x32x16xf32>
    %6 = vector.shape_cast %5 : vector<1x32x16xf32> to vector<32x16xf32>
    %c0_4 = arith.constant 0 : index
    %c0_5 = arith.constant 0 : index
    %7 = vector.load %arg4[%c0_4, %c0_5] : memref<16x128xf32, #tpu.memory_space<vmem>>, vector<16x128xf32>
    %c0_6 = arith.constant 0 : index
    %c0_7 = arith.constant 0 : index
    %8 = vector.load %arg5[%c0_6, %c0_7] : memref<16x128xf32, #tpu.memory_space<vmem>>, vector<16x128xf32>
    %cst = arith.constant dense<0.000000e+00> : vector<32x128xf32>
    %9 = tpu.matmul %6, %8, %cst {dimension_numbers = #tpu.dot_dimension_numbers<[1], [0], [0], [1], [0, 0, 1, 1], [], []>} : vector<32x16xf32>, vector<16x128xf32>, vector<32x128xf32> -> vector<32x128xf32>
    %c0_8 = arith.constant 0 : index
    %c0_9 = arith.constant 0 : index
    %10 = vector.load %arg6[%c0_8, %c0_9] : memref<1x128xf32, #tpu.memory_space<vmem>>, vector<1x128xf32>
    %11 = vector.broadcast %10 : vector<1x128xf32> to vector<32x128xf32>
    %12 = arith.addf %9, %11 : vector<32x128xf32>
    %c0_10 = arith.constant 0 : index
    %c0_11 = arith.constant 0 : index
    %c0_12 = arith.constant 0 : index
    %13 = vector.load %arg3[%c0_10, %c0_11, %c0_12] : memref<1x32x4xi32, #tpu.memory_space<vmem>>, vector<1x32x4xi32>
    %14 = vector.shape_cast %13 : vector<1x32x4xi32> to vector<32x4xi32>
    %15 = tpu.iota {dimensions = array<i32: 1>} : vector<32x32xi32>
    %16 = vector.extract_strided_slice %14 {offsets = [0, 0], sizes = [32, 1], strides = [1, 1]} : vector<32x4xi32> to vector<32x1xi32>
    %17 = vector.broadcast %16 : vector<32x1xi32> to vector<32x32xi32>
    %18 = arith.cmpi eq, %17, %15 : vector<32x32xi32>
    %19 = arith.extui %18 : vector<32x32xi1> to vector<32x32xi32>
    %20 = arith.sitofp %19 : vector<32x32xi32> to vector<32x32xf32>
    %cst_13 = arith.constant dense<0.000000e+00> : vector<32x16xf32>
    %21 = tpu.matmul %20, %3, %cst_13 {dimension_numbers = #tpu.dot_dimension_numbers<[1], [0], [0], [1], [0, 0, 1, 1], [], []>} : vector<32x32xf32>, vector<32x16xf32>, vector<32x16xf32> -> vector<32x16xf32>
    %cst_14 = arith.constant dense<0.000000e+00> : vector<32x128xf32>
    %22 = tpu.matmul %21, %7, %cst_14 {dimension_numbers = #tpu.dot_dimension_numbers<[1], [0], [0], [1], [0, 0, 1, 1], [], []>} : vector<32x16xf32>, vector<16x128xf32>, vector<32x128xf32> -> vector<32x128xf32>
    %23 = arith.addf %22, %12 : vector<32x128xf32>
    %24 = vector.extract_strided_slice %14 {offsets = [0, 1], sizes = [32, 1], strides = [1, 1]} : vector<32x4xi32> to vector<32x1xi32>
    %25 = vector.broadcast %24 : vector<32x1xi32> to vector<32x32xi32>
    %26 = arith.cmpi eq, %25, %15 : vector<32x32xi32>
    %27 = arith.extui %26 : vector<32x32xi1> to vector<32x32xi32>
    %28 = arith.sitofp %27 : vector<32x32xi32> to vector<32x32xf32>
    %cst_15 = arith.constant dense<0.000000e+00> : vector<32x16xf32>
    %29 = tpu.matmul %28, %3, %cst_15 {dimension_numbers = #tpu.dot_dimension_numbers<[1], [0], [0], [1], [0, 0, 1, 1], [], []>} : vector<32x32xf32>, vector<32x16xf32>, vector<32x16xf32> -> vector<32x16xf32>
    %cst_16 = arith.constant dense<0.000000e+00> : vector<32x128xf32>
    %30 = tpu.matmul %29, %7, %cst_16 {dimension_numbers = #tpu.dot_dimension_numbers<[1], [0], [0], [1], [0, 0, 1, 1], [], []>} : vector<32x16xf32>, vector<16x128xf32>, vector<32x128xf32> -> vector<32x128xf32>
    %31 = arith.addf %30, %12 : vector<32x128xf32>
    %32 = arith.maximumf %23, %31 : vector<32x128xf32>
    %33 = vector.extract_strided_slice %14 {offsets = [0, 2], sizes = [32, 1], strides = [1, 1]} : vector<32x4xi32> to vector<32x1xi32>
    %34 = vector.broadcast %33 : vector<32x1xi32> to vector<32x32xi32>
    %35 = arith.cmpi eq, %34, %15 : vector<32x32xi32>
    %36 = arith.extui %35 : vector<32x32xi1> to vector<32x32xi32>
    %37 = arith.sitofp %36 : vector<32x32xi32> to vector<32x32xf32>
    %cst_17 = arith.constant dense<0.000000e+00> : vector<32x16xf32>
    %38 = tpu.matmul %37, %3, %cst_17 {dimension_numbers = #tpu.dot_dimension_numbers<[1], [0], [0], [1], [0, 0, 1, 1], [], []>} : vector<32x32xf32>, vector<32x16xf32>, vector<32x16xf32> -> vector<32x16xf32>
    %cst_18 = arith.constant dense<0.000000e+00> : vector<32x128xf32>
    %39 = tpu.matmul %38, %7, %cst_18 {dimension_numbers = #tpu.dot_dimension_numbers<[1], [0], [0], [1], [0, 0, 1, 1], [], []>} : vector<32x16xf32>, vector<16x128xf32>, vector<32x128xf32> -> vector<32x128xf32>
    %40 = arith.addf %39, %12 : vector<32x128xf32>
    %41 = arith.maximumf %32, %40 : vector<32x128xf32>
    %42 = vector.extract_strided_slice %14 {offsets = [0, 3], sizes = [32, 1], strides = [1, 1]} : vector<32x4xi32> to vector<32x1xi32>
    %43 = vector.broadcast %42 : vector<32x1xi32> to vector<32x32xi32>
    %44 = arith.cmpi eq, %43, %15 : vector<32x32xi32>
    %45 = arith.extui %44 : vector<32x32xi1> to vector<32x32xi32>
    %46 = arith.sitofp %45 : vector<32x32xi32> to vector<32x32xf32>
    %cst_19 = arith.constant dense<0.000000e+00> : vector<32x16xf32>
    %47 = tpu.matmul %46, %3, %cst_19 {dimension_numbers = #tpu.dot_dimension_numbers<[1], [0], [0], [1], [0, 0, 1, 1], [], []>} : vector<32x32xf32>, vector<32x16xf32>, vector<32x16xf32> -> vector<32x16xf32>
    %cst_20 = arith.constant dense<0.000000e+00> : vector<32x128xf32>
    %48 = tpu.matmul %47, %7, %cst_20 {dimension_numbers = #tpu.dot_dimension_numbers<[1], [0], [0], [1], [0, 0, 1, 1], [], []>} : vector<32x16xf32>, vector<16x128xf32>, vector<32x128xf32> -> vector<32x128xf32>
    %49 = arith.addf %48, %12 : vector<32x128xf32>
    %50 = arith.maximumf %41, %49 : vector<32x128xf32>
    %cst_21 = arith.constant 0.000000e+00 : f32
    %51 = vector.broadcast %cst_21 : f32 to vector<32x128xf32>
    %52 = arith.maximumf %50, %51 : vector<32x128xf32>
    %c0_22 = arith.constant 0 : index
    %c0_23 = arith.constant 0 : index
    %c0_24 = arith.constant 0 : index
    %53 = vector.load %arg7[%c0_22, %c0_23, %c0_24] : memref<1x32x128xf32, #tpu.memory_space<vmem>>, vector<1x32x128xf32>
    %54 = vector.shape_cast %53 : vector<1x32x128xf32> to vector<32x128xf32>
    %55 = vector.shape_cast %52 : vector<32x128xf32> to vector<1x32x128xf32>
    tpu.vector_store %arg7[%c0_22, %c0_23, %c0_24], %55 {strides = array<i32>} : memref<1x32x128xf32, #tpu.memory_space<vmem>>, vector<1x32x128xf32>,
    return
  }
  func.func @transform_0(%arg0: i32, %arg1: i32) -> (i32, i32, i32) {
    %c0_i32 = arith.constant 0 : i32
    %c0_i32_0 = arith.constant 0 : i32
    %c0_i32_1 = arith.constant 0 : i32
    return %arg0, %c0_i32, %c0_i32_0 : i32, i32, i32
  }
  func.func @transform_1(%arg0: i32, %arg1: i32) -> (i32, i32, i32) {
    %c0_i32 = arith.constant 0 : i32
    %c0_i32_0 = arith.constant 0 : i32
    return %arg0, %arg1, %c0_i32 : i32, i32, i32
  }
  func.func @transform_2(%arg0: i32, %arg1: i32) -> (i32, i32) {
    %c0_i32 = arith.constant 0 : i32
    %c0_i32_0 = arith.constant 0 : i32
    %c0_i32_1 = arith.constant 0 : i32
    return %c0_i32, %c0_i32_0 : i32, i32
  }
  func.func @transform_3(%arg0: i32, %arg1: i32) -> (i32, i32) {
    %c0_i32 = arith.constant 0 : i32
    %c0_i32_0 = arith.constant 0 : i32
    %c0_i32_1 = arith.constant 0 : i32
    return %c0_i32, %c0_i32_0 : i32, i32
  }
  func.func @transform_4(%arg0: i32, %arg1: i32) -> (i32, i32) {
    %c0_i32 = arith.constant 0 : i32
    %c0_i32_0 = arith.constant 0 : i32
    %c0_i32_1 = arith.constant 0 : i32
    return %c0_i32, %c0_i32_0 : i32, i32
  }
  func.func @transform_5(%arg0: i32, %arg1: i32) -> (i32, i32, i32) {
    %c0_i32 = arith.constant 0 : i32
    %c0_i32_0 = arith.constant 0 : i32
    return %arg0, %arg1, %c0_i32 : i32, i32, i32
  }
}

</mosaic_0001>

<bundles_post_ra>
// kernel: tpu_custom_call.1
= control target key start
LH: loop header
LB: loop body
LE: loop exit
PB: predicated region body
PF: predicated region fallthrough
CT: control target
= control target key end

     0   :  { %10 = vsyncpa [#allocation3], 0  ;;  %s2086_s0 = inlined_call_operand.vmem [shape: f32[2,32,16], index: 0, kind: input, shape index: {}]   ;;  %s2087_s1 = inlined_call_operand.vmem [shape: s32[2,32,4], index: 1, kind: input, shape index: {}]   ;;  %s2088_s2 = inlined_call_operand.vmem [shape: f32[16,128], index: 2, kind: input, shape index: {}]   ;;  %s2089_s3 = inlined_call_operand.vmem [shape: f32[16,128], index: 3, kind: input, shape index: {}]   ;;  %s2090_s4 = inlined_call_operand.vmem [shape: f32[1,128], index: 4, kind: input, shape index: {}]   ;;  %s2091_s5 = inlined_call_operand.hbm [shape: f32[2,32,128], index: 5, kind: output, shape index: {}]  }
   0x1   :  { %12 = vsyncpa [#allocation3 + $0x1], 0  ;;  %s1826_s18 = smov 0   ;;  %s1828_s19 = smov 0  }
   0x2   :  { %s1830_s20 = smov 0   ;;  %s1832_s21 = smov 0  }
   0x3   :  { %s1834_s22 = smov 0   ;;  %s1836_s23 = smov 0  }
   0x4 LB: > { %s1401_s24 = sadd.s32 4294967295, %s1786_s23   ;;  %s1402_s25 = sadd.s32 4294967294, %s1786_s23   ;;  %s1786_s23 = sphi %s1836_s23, %s18_s23   ;;  %s1782_s22 = sphi %s1834_s22, %s2098_s22   ;;  %s1778_s21 = sphi %s1832_s21, %s2097_s21   ;;  %s1774_s20 = sphi %s1830_s20, %s2096_s20   ;;  %s1770_s19 = sphi %s1828_s19, %s2095_s19   ;;  %s1766_s18 = sphi %s1826_s18, %s2094_s18  }
   0x5   : > { %s30_s26 = sadd.s32 1, %s1782_s22  ;;  %s156_s27 = sadd.s32 1, %s1774_s20 }
   0x6   : > { %p32_p0 = scmp.ge.s32.totalorder %s30_s26, 2  ;;  %p166_p1 = scmp.ne.s32.totalorder %s1774_s20, %s1770_s19 }
   0x7   : > { %p167_p2 = scmp.eq.s32.totalorder %s1401_s24, 1  ;;  %p172_p3 = scmp.ne.s32.totalorder %s1770_s19, %s1766_s18 }
   0x8   : > { %s2100_s26 = smov (%p32_p0, %s30_s26), 0  ;;  %p173_p5 = scmp.eq.s32.totalorder %s1402_s25, 1 }
   0x9   : > { %p1866_p4 = por %p167_p2, %p166_p1  ;;  %s151_s29 = ssub.s32 %s1782_s22, %s2100_s26 }
   0xa   : > { %p1405_p6 = scmp.ge.s32.totalorder %s1786_s23, 1  ;;  %p154_p7 = scmp.eq.s32.totalorder %s151_s29, 0 }
   0xb   : > { %p1873_p8 = por %p173_p5, %p172_p3  ;;  %p221_p9 = scmp.lt.s32.totalorder %s1786_s23, 3 }
   0xc   : > { %s1879_s6 = scalar_select %p154_p7, %s1774_s20, %s156_s27  }
   0xd   : > { %p222_p10 = pnand %p1405_p6, %p221_p9 }
   0xe   : > { %p258_p11 = scmp.lt.s32.totalorder (!%p222_p10), %s1778_s21, 1  ;;  %s255_s10 = sand.u32 (!%p222_p10), 1, %s1770_s19  }
   0xf   : > { %225 = sbr.rel (%p222_p10) target bundleno = 598 (0x256), region = 40  ;;  %s2041_s24 = scalar_lea.sflag (!%p222_p10), [#allocation3], %s255_s10 }
  0x10   : > { %s1793_s25 = smov (!%p222_p10), [#allocation2]  }
  0x11   : > { %s1714_s27 = sshll.u32 (!%p222_p10), %s1793_s25, 4  ;;  %s1715_s27 = int_to_ptr.vmem [resolvable:$false] %s1714_s27 }
  0x12   : > { %s1716_s29 = scalar_lea.vmem (!%p222_p10), %s1715_s27, 1024 }
  0x14   : > { %v1788_v0 = vmov 0   ;;  %s259_s7 = scalar_select %p258_p11, %s1778_s21, 1  ;;  %v1789_v9 = vmov 1   ;;  %v1790_v10 = vmov 2   ;;  %v1791_v11 = vmov 3   ;;  %v287_v12 = vld [vmem:[%s2089_s3 + $0x8] sm:$0xff] }
  0x15   : > { %1703 = vset.pattern.permute.xlu1 %v1788_v0  ;;  %1702 = vset.pattern.permute.xlu0 %v1788_v0  ;;  %v286_v13 = vld [vmem:[%s2089_s3] sm:$0xff]  ;;  %vm295_vm0 = vcmask 130048   ;;  %v1917_v14 = vld [vmem:[%s2088_s2 + $0x8] sm:$0xff]  ;;  %v397_v15 = vlaneseq  ;;  %vm423_vm1 = vcmask 261120   ;;  %v1792_v19 = vmov 0.0  }
  0x16   : > { %s1469_s8 = sshll.u32 %s259_s7, 5  ;;  %1534 = vmatprep.subr.mxu0 %v287_v12  ;;  %v284_v50 = vld [vmem:[%s2088_s2] sm:$0xff] }
  0x17   : > { %s271_s11 = scalar_lea.vmem %s2087_s1, %s1469_s8  ;;  %s262_s14 = scalar_lea.vmem %s2086_s0, %s1469_s8  ;;  %1535 = vmatpush3.msra.mxu0 %v287_v12  ;;  %v1927_v16 = vand.u32 127, %v397_v15 }
  0x18   : > { %v395_v1 = vld [vmem:[%s271_s11 + $0x10] sm:$0xff]  ;;  %v393_v2 = vld [vmem:[%s271_s11] sm:$0xff]  ;;  %v1889_v3 = vld [vmem:[%s262_s14 + $0x18] sm:$0xff]  ;;  %1536 = vmatprep.subr.mxu0 %v286_v13 }
  0x19   : > { %406 = vperm.xlu1 %1703, %v395_v1   ;;  %400 = vperm.xlu0 %1702, %v393_v2   ;;  %v1891_v4 = vld [vmem:[%s262_s14 + $0x10] sm:$0xff]  ;;  %v396_v5 = vld [vmem:[%s271_s11 + $0x18] sm:$0xff]  ;;  %v394_v6 = vld [vmem:[%s271_s11 + $0x8] sm:$0xff]  ;;  %s1406_s11 = sshll.u32 %s255_s10, 5 }
  0x1a   : > { %1544 = vmatprep.subr.mxu1 %v1889_v3  ;;  %v1896_v7 = vld [vmem:[%s262_s14 + $0x8] sm:$0xff]  ;;  %v1901_v8 = vld [vmem:[%s262_s14] sm:$0xff]  ;;  %1537 = vmatpush3.msra.mxu0 %v286_v13  ;;  %s257_s12 = scalar_lea.vmem [#allocation2], %s1406_s11  ;;  %s1471_s14 = sshll.u32 %s1778_s21, 9 }
  0x1b   : > { %1545 = vmatpush3.msra.mxu1 %v1889_v3  ;;  %1538 = vmatprep.mubr.msk.f32.mxu0 %vm295_vm0, %v1901_v8  ;;  %s1308_s13 = sshll.u32 %s257_s12, 4  ;;  %s2037_s17 = scalar_lea.hbm %s2091_s5, %s1471_s14  ;;  %s2032_s13 = int_to_ptr.vmem [resolvable:$true] %s1308_s13 }
  0x1c   : > { %1546 = vmatprep.subr.mxu1 %v1891_v4  ;;  %1539 = vmatmul.mubr.msk.f32.vlgmr.msra.gmra.mxu0 %vm295_vm0, %v1896_v7  ;;  %s1710_s21 = scalar_lea.vmem %s2032_s13, 512  ;;  %p1717_p1 = scmp.lt.s32.totalorder %s2032_s13, %s1715_s27 }
  0x1d   : > { %409 = vperm.xlu1 %1703, %v396_v5   ;;  %403 = vperm.xlu0 %1702, %v394_v6   ;;  %p1711_p12 = scmp.ne.s32.totalorder %s2032_s13, %s1710_s21  ;;  %p1718_p2 = scmp.lt.s32.totalorder %s1716_s29, %s1710_s21 }
  0x1e   : > { %1547 = vmatpush3.msra.mxu1 %v1891_v4  ;;  %1558 = vmatprep.subr.mxu0 %v1917_v14 }
  0x1f   : > { %1548 = vmatprep.subr.mxu1 %v1896_v7  ;;  %1541 = vmatprep.mubr.msk.f32.mxu0 %vm295_vm0, %v1891_v4  ;;  %p1712_p13 = pnand %p1711_p12, %p1866_p4  ;;  %p1719_p3 = por %p1718_p2, %p1717_p1 }
  0x20   : > { %1549 = vmatpush3.msra.mxu1 %v1896_v7  ;;  %1559 = vmatpush3.msra.mxu0 %v1917_v14 }
  0x21   : > { %1705 = vset.pattern.permute.xlu1 %v1789_v9  ;;  %1704 = vset.pattern.permute.xlu0 %v1789_v9  ;;  %p1713_p0 = pneg %p1712_p13 }
  0x22   : > { %622 = vperm.xlu1 %1705, %v394_v6   ;;  %619 = vperm.xlu0 %1704, %v393_v2  }
  0x23   : > { %1550 = vmatprep.subr.mxu1 %v1901_v8  ;;  %1542 = vmatmul.mubr.msk.f32.gmra.mxu0 %vm295_vm0, %v1889_v3  ;;  %p1720_p5 = pnand %p1719_p3, %p1713_p0 }
  0x24   : > { %1551 = vmatpush3.msra.mxu1 %v1901_v8  ;;  %1560 = vmatprep.subr.mxu0 %v284_v50 }
  0x25   : > { %1568 = vmatprep.subr.mxu1 %v1889_v3  ;;  %1561 = vmatpush3.msra.mxu0 %v284_v50 }
  0x26   : > { %625 = vperm.xlu1 %1705, %v395_v1   ;;  %628 = vperm.xlu0 %1704, %v396_v5  }
  0x27   : > { %1582 = vmatprep.subr.mxu0 %v1917_v14 }
  0x2a   : > { %1706 = vset.pattern.permute.xlu1 %v1790_v10  ;;  %1707 = vset.pattern.permute.xlu0 %v1790_v10 }
  0x2b   : > { %841 = vperm.xlu1 %1706, %v393_v2   ;;  %844 = vperm.xlu0 %1707, %v394_v6  }
  0x2f   : > { %847 = vperm.xlu1 %1706, %v395_v1   ;;  %1708 = vset.pattern.permute.xlu0 %v1791_v11 }
  0x30   : > { %1063 = vperm.xlu0 %1708, %v393_v2  }
  0x33   : > { %850 = vperm.xlu1 %1706, %v396_v5  }
  0x34   : > { %1072 = vperm.xlu0 %1708, %v396_v5  }
  0x37   : > { %1709 = vset.pattern.permute.xlu1 %v1791_v11 }
  0x38   : > { %1066 = vperm.xlu1 %1709, %v394_v6  }
  0x3c   : > { %1069 = vperm.xlu1 %1709, %v395_v1  }
  0x94   : > { %v407_v17 = vpop.permute.xlu1 %406  ;;  %v401_v18 = vpop.permute.xlu0 %400 }
  0x95   : > { %vm411_vm2 = vcmp.eq.s32.totalorder %v401_v18, %v1927_v16  ;;  %vm413_vm3 = vcmp.eq.s32.totalorder %v407_v17, %v1927_v16 }
  0x96   : > { %v1416_v20 = vsel %vm411_vm2, 1.0, %v1792_v19  ;;  %v1418_v24 = vsel %vm413_vm3, 1.0, %v1792_v19 }
  0x97   : > { %1552 = vmatprep.mubr.msk.f32.mxu1 %vm423_vm1, %v1416_v20 }
  0x98   : > { %v410_v21 = vpop.permute.xlu1 %409  ;;  %v404_v22 = vpop.permute.xlu0 %403 }
  0x99   : > { %vm412_vm4 = vcmp.eq.s32.totalorder %v404_v22, %v1927_v16  ;;  %vm414_vm5 = vcmp.eq.s32.totalorder %v410_v21, %v1927_v16 }
  0x9a   : > { %v1417_v23 = vsel %vm412_vm4, 1.0, %v1792_v19  ;;  %v1419_v27 = vsel %vm414_vm5, 1.0, %v1792_v19 }
  0x9b   : > { %1553 = vmatmul.mubr.msk.f32.vlgmr.msra.gmra.mxu1 %vm423_vm1, %v1417_v23 }
  0x9c   : > { %1555 = vmatprep.mubr.msk.f32.mxu1 %vm423_vm1, %v1418_v24  ;;  %1569 = vmatpush3.msra.mxu1 %v1889_v3 }
  0x9d   : > { %v623_v25 = vpop.permute.xlu1 %622  ;;  %1570 = vmatprep.subr.mxu1 %v1891_v4  ;;  %v620_v26 = vpop.permute.xlu0 %619 }
  0x9e   : > { %1571 = vmatpush3.msra.mxu1 %v1891_v4  ;;  %vm630_vm6 = vcmp.eq.s32.totalorder %v620_v26, %v1927_v16  ;;  %vm631_vm7 = vcmp.eq.s32.totalorder %v623_v25, %v1927_v16 }
  0x9f   : > { %v1428_v28 = vsel %vm630_vm6, 1.0, %v1792_v19  ;;  %1556 = vmatmul.mubr.msk.f32.gmra.mxu1 %vm423_vm1, %v1419_v27  ;;  %1572 = vmatprep.subr.mxu1 %v1896_v7  ;;  %v1429_v31 = vsel %vm631_vm7, 1.0, %v1792_v19 }
  0xa0   : > { %1573 = vmatpush3.msra.mxu1 %v1896_v7  ;;  %1576 = vmatprep.mubr.msk.f32.mxu1 %vm423_vm1, %v1428_v28 }
  0xa1   : > { %v626_v29 = vpop.permute.xlu1 %625  ;;  %1574 = vmatprep.subr.mxu1 %v1901_v8  ;;  %v629_v30 = vpop.permute.xlu0 %628 }
  0xa2   : > { %vm632_vm8 = vcmp.eq.s32.totalorder %v626_v29, %v1927_v16  ;;  %1575 = vmatpush3.msra.mxu1 %v1901_v8  ;;  %vm633_vm9 = vcmp.eq.s32.totalorder %v629_v30, %v1927_v16 }
  0xa3   : > { %v1430_v32 = vsel %vm632_vm8, 1.0, %v1792_v19  ;;  %1577 = vmatmul.mubr.msk.f32.vlgmr.msra.gmra.mxu1 %vm423_vm1, %v1429_v31  ;;  %1592 = vmatprep.subr.mxu1 %v1889_v3  ;;  %v1431_v33 = vsel %vm633_vm9, 1.0, %v1792_v19 }
  0xa4   : > { %1579 = vmatprep.mubr.msk.f32.mxu1 %vm423_vm1, %v1430_v32  ;;  %1593 = vmatpush3.msra.mxu1 %v1889_v3 }
  0xa5   : > { %1594 = vmatprep.subr.mxu1 %v1891_v4 }
  0xa6   : > { %v842_v34 = vpop.permute.xlu1 %841  ;;  %1595 = vmatpush3.msra.mxu1 %v1891_v4  ;;  %v845_v35 = vpop.permute.xlu0 %844 }
  0xa7   : > { %vm852_vm10 = vcmp.eq.s32.totalorder %v842_v34, %v1927_v16  ;;  %1580 = vmatmul.mubr.msk.f32.gmra.mxu1 %vm423_vm1, %v1431_v33  ;;  %1596 = vmatprep.subr.mxu1 %v1896_v7  ;;  %vm853_vm11 = vcmp.eq.s32.totalorder %v845_v35, %v1927_v16 }
  0xa8   : > { %v1440_v36 = vsel %vm852_vm10, 1.0, %v1792_v19  ;;  %v1441_v37 = vsel %vm853_vm11, 1.0, %v1792_v19  ;;  %1597 = vmatpush3.msra.mxu1 %v1896_v7 }
  0xa9   : > { %1598 = vmatprep.subr.mxu1 %v1901_v8  ;;  %1600 = vmatprep.mubr.msk.f32.mxu1 %vm423_vm1, %v1440_v36 }
  0xaa   : > { %v848_v38 = vpop.permute.xlu1 %847  ;;  %1599 = vmatpush3.msra.mxu1 %v1901_v8 }
  0xab   : > { %vm854_vm12 = vcmp.eq.s32.totalorder %v848_v38, %v1927_v16  ;;  %1601 = vmatmul.mubr.msk.f32.vlgmr.msra.gmra.mxu1 %vm423_vm1, %v1441_v37  ;;  %1616 = vmatprep.subr.mxu1 %v1889_v3  ;;  %v1064_v39 = vpop.permute.xlu0 %1063 }
  0xac   : > { %v1442_v40 = vsel %vm854_vm12, 1.0, %v1792_v19  ;;  %vm1074_vm13 = vcmp.eq.s32.totalorder %v1064_v39, %v1927_v16  ;;  %1617 = vmatpush3.msra.mxu1 %v1889_v3 }
  0xad   : > { %1603 = vmatprep.mubr.msk.f32.mxu1 %vm423_vm1, %v1442_v40  ;;  %1618 = vmatprep.subr.mxu1 %v1891_v4  ;;  %v1452_v42 = vsel %vm1074_vm13, 1.0, %v1792_v19 }
  0xae   : > { %v851_v41 = vpop.permute.xlu1 %850  ;;  %1619 = vmatpush3.msra.mxu1 %v1891_v4 }
  0xaf   : > { %vm855_vm14 = vcmp.eq.s32.totalorder %v851_v41, %v1927_v16  ;;  %1620 = vmatprep.subr.mxu1 %v1896_v7  ;;  %v1073_v45 = vpop.permute.xlu0 %1072 }
  0xb0   : > { %v1443_v43 = vsel %vm855_vm14, 1.0, %v1792_v19  ;;  %1621 = vmatpush3.msra.mxu1 %v1896_v7  ;;  %vm1077_vm2 = vcmp.eq.s32.totalorder %v1073_v45, %v1927_v16 }
  0xb1   : > { %1604 = vmatmul.mubr.msk.f32.gmra.mxu1 %vm423_vm1, %v1443_v43  ;;  %1622 = vmatprep.subr.mxu1 %v1901_v8  ;;  %v1455_v49 = vsel %vm1077_vm2, 1.0, %v1792_v19 }
  0xb2   : > { %1623 = vmatpush3.msra.mxu1 %v1901_v8  ;;  %1624 = vmatprep.mubr.msk.f32.mxu1 %vm423_vm1, %v1452_v42 }
  0xb3   : > { %v1067_v44 = vpop.permute.xlu1 %1066 }
  0xb4   : > { %vm1075_vm15 = vcmp.eq.s32.totalorder %v1067_v44, %v1927_v16 }
  0xb5   : > { %v1453_v46 = vsel %vm1075_vm15, 1.0, %v1792_v19 }
  0xb6   : > { %1625 = vmatmul.mubr.msk.f32.vlgmr.msra.gmra.mxu1 %vm423_vm1, %v1453_v46 }
  0xb7   : > { %v1070_v47 = vpop.permute.xlu1 %1069 }
  0xb8   : > { %vm1076_vm3 = vcmp.eq.s32.totalorder %v1070_v47, %v1927_v16  ;;  %v1411_v16 = vld [vmem:[%s2090_s4] ss:$0 sm:$0xff] }
  0xb9   : > { %v1454_v48 = vsel %vm1076_vm3, 1.0, %v1792_v19 }
  0xba   : > { %1627 = vmatprep.mubr.msk.f32.mxu1 %vm423_vm1, %v1454_v48 }
  0xbb   : > { %1628 = vmatmul.mubr.msk.f32.gmra.mxu1 %vm423_vm1, %v1455_v49 }
  0xdc   : > { %v1540_v3 = vpop.f32.mrf.mxu0 }
  0xdd   : > { %v380_v17 = vadd.f32 %v1540_v3, %v1411_v16 }
  0xde   : > { %v374_v4 = vpop.f32.mrf.mxu0 }
  0xdf   : > { %v375_v19 = vadd.f32 %v1411_v16, %v374_v4 }
  0xe3   : > { %v1543_v5 = vpop.f32.mrf.mxu0 }
  0xe4   : > { %v390_v26 = vadd.f32 %v1543_v5, %v1411_v16 }
  0xe5   : > { %v384_v6 = vpop.f32.mrf.mxu0 }
  0xe6   : > { %v385_v30 = vadd.f32 %v1411_v16, %v384_v6 }
 0x15b   : > { %v1554_v51 = vpop.f32.mrf.mxu1 }
 0x15d   : > { %v502_v52 = vpop.f32.mrf.mxu1 }
 0x15e   : > { %1562 = vmatprep.mubr.msk.f32.mxu0 %vm295_vm0, %v502_v52 }
 0x15f   : > { %v1557_v53 = vpop.f32.mrf.mxu1  ;;  %1563 = vmatmul.mubr.msk.f32.vlgmr.msra.gmra.mxu0 %vm295_vm0, %v1554_v51 }
 0x160   : > { %1583 = vmatpush3.msra.mxu0 %v1917_v14 }
 0x161   : > { %v512_v54 = vpop.f32.mrf.mxu1  ;;  %1584 = vmatprep.subr.mxu0 %v284_v50 }
 0x162   : > { %1565 = vmatprep.mubr.msk.f32.mxu0 %vm295_vm0, %v512_v54  ;;  %1585 = vmatpush3.msra.mxu0 %v284_v50 }
 0x163   : > { %1566 = vmatmul.mubr.msk.f32.gmra.mxu0 %vm295_vm0, %v1557_v53  ;;  %v1578_v55 = vpop.f32.mrf.mxu1  ;;  %1606 = vmatprep.subr.mxu0 %v1917_v14 }
 0x165   : > { %v720_v56 = vpop.f32.mrf.mxu1 }
 0x166   : > { %1586 = vmatprep.mubr.msk.f32.mxu0 %vm295_vm0, %v720_v56 }
 0x167   : > { %v1581_v57 = vpop.f32.mrf.mxu1  ;;  %1587 = vmatmul.mubr.msk.f32.vlgmr.msra.gmra.mxu0 %vm295_vm0, %v1578_v55 }
 0x168   : > { %1607 = vmatpush3.msra.mxu0 %v1917_v14 }
 0x169   : > { %v730_v58 = vpop.f32.mrf.mxu1  ;;  %1608 = vmatprep.subr.mxu0 %v284_v50 }
 0x16a   : > { %1589 = vmatprep.mubr.msk.f32.mxu0 %vm295_vm0, %v730_v58  ;;  %1609 = vmatpush3.msra.mxu0 %v284_v50 }
 0x16b   : > { %1590 = vmatmul.mubr.msk.f32.gmra.mxu0 %vm295_vm0, %v1581_v57  ;;  %v1602_v59 = vpop.f32.mrf.mxu1  ;;  %1630 = vmatprep.subr.mxu0 %v1917_v14 }
 0x16d   : > { %v942_v60 = vpop.f32.mrf.mxu1 }
 0x16e   : > { %1610 = vmatprep.mubr.msk.f32.mxu0 %vm295_vm0, %v942_v60 }
 0x16f   : > { %1611 = vmatmul.mubr.msk.f32.vlgmr.msra.gmra.mxu0 %vm295_vm0, %v1602_v59 }
 0x170   : > { %1631 = vmatpush3.msra.mxu0 %v1917_v14 }
 0x171   : > { %v1605_v61 = vpop.f32.mrf.mxu1  ;;  %1632 = vmatprep.subr.mxu0 %v284_v50 }
 0x172   : > { %1633 = vmatpush3.msra.mxu0 %v284_v50 }
 0x173   : > { %v952_v62 = vpop.f32.mrf.mxu1 }
 0x174   : > { %1613 = vmatprep.mubr.msk.f32.mxu0 %vm295_vm0, %v952_v62 }
 0x175   : > { %1614 = vmatmul.mubr.msk.f32.gmra.mxu0 %vm295_vm0, %v1605_v61 }
 0x176   : > { %v1626_v63 = vpop.f32.mrf.mxu1 }
 0x178   : > { %v1164_v0 = vpop.f32.mrf.mxu1 }
 0x179   : > { %1634 = vmatprep.mubr.msk.f32.mxu0 %vm295_vm0, %v1164_v0 }
 0x17a   : > { %1635 = vmatmul.mubr.msk.f32.vlgmr.msra.gmra.mxu0 %vm295_vm0, %v1626_v63 }
 0x17b   : > { %v1629_v1 = vpop.f32.mrf.mxu1 }
 0x17d   : > { %v1174_v2 = vpop.f32.mrf.mxu1 }
 0x17e   : > { %1637 = vmatprep.mubr.msk.f32.mxu0 %vm295_vm0, %v1174_v2 }
 0x17f   : > { %1638 = vmatmul.mubr.msk.f32.gmra.mxu0 %vm295_vm0, %v1629_v1 }
 0x21f   : > { %v1564_v7 = vpop.f32.mrf.mxu0 }
 0x220   : > { %v605_v22 = vadd.f32 %v1564_v7, %v380_v17 }
 0x221   : > { %v599_v8 = vpop.f32.mrf.mxu0 }
 0x222   : > { %v600_v27 = vadd.f32 %v599_v8, %v375_v19 }
 0x223   : > { %v1567_v9 = vpop.f32.mrf.mxu0 }
 0x224   : > { %v615_v36 = vadd.f32 %v1567_v9, %v390_v26 }
 0x225   : > { %v609_v10 = vpop.f32.mrf.mxu0 }
 0x226   : > { %v610_v43 = vadd.f32 %v609_v10, %v385_v30 }
 0x227   : > { %v1588_v11 = vpop.f32.mrf.mxu0 }
 0x228   : > { %v823_v20 = vadd.f32 %v1588_v11, %v380_v17 }
 0x229   : > { %v817_v12 = vpop.f32.mrf.mxu0 }
 0x22a   : > { %v818_v23 = vadd.f32 %v817_v12, %v375_v19  ;;  %v837_v28 = vmax.f32 %v605_v22, %v823_v20 }
 0x22b   : > { %v1591_v13 = vpop.f32.mrf.mxu0 }
 0x22c   : > { %v833_v31 = vadd.f32 %v1591_v13, %v390_v26  ;;  %v836_v33 = vmax.f32 %v600_v27, %v818_v23 }
 0x22d   : > { %v827_v14 = vpop.f32.mrf.mxu0 }
 0x22e   : > { %v828_v37 = vadd.f32 %v827_v14, %v385_v30  ;;  %v839_v44 = vmax.f32 %v615_v36, %v833_v31 }
 0x22f   : > { %v1612_v15 = vpop.f32.mrf.mxu0 }
 0x230   : > { %v1045_v24 = vadd.f32 %v1612_v15, %v380_v17  ;;  %v838_v49 = vmax.f32 %v610_v43, %v828_v37 }
 0x231   : > { %v1039_v18 = vpop.f32.mrf.mxu0 }
 0x232   : > { %v1040_v29 = vadd.f32 %v1039_v18, %v375_v19  ;;  %v1059_v34 = vmax.f32 %v837_v28, %v1045_v24 }
 0x234   : > { %v1058_v40 = vmax.f32 %v836_v33, %v1040_v29 }
 0x235   : > { %v1615_v21 = vpop.f32.mrf.mxu0 }
 0x236   : > { %v1055_v38 = vadd.f32 %v1615_v21, %v390_v26 }
 0x237   : > { %v1049_v25 = vpop.f32.mrf.mxu0 }
 0x238   : > { %v1050_v45 = vadd.f32 %v1049_v25, %v385_v30  ;;  %v1061_v50 = vmax.f32 %v839_v44, %v1055_v38 }
 0x23a   : > { %v1636_v32 = vpop.f32.mrf.mxu0  ;;  %v1060_v54 = vmax.f32 %v838_v49, %v1050_v45 }
 0x23b   : > { %v1267_v35 = vadd.f32 %v1636_v32, %v380_v17 }
 0x23c   : > { %v1261_v39 = vpop.f32.mrf.mxu0 }
 0x23d   : > { %v1281_v41 = vmax.f32 %v1059_v34, %v1267_v35  ;;  %v1262_v42 = vadd.f32 %v1261_v39, %v375_v19 }
 0x23f   : > { %v1285_v46 = vmax.f32 %v1281_v41, 0.0  ;;  %v1280_v47 = vmax.f32 %v1058_v40, %v1262_v42  ;;  %v1639_v48 = vpop.f32.mrf.mxu0 }
 0x240   : > { %v1277_v51 = vadd.f32 %v1639_v48, %v390_v26 }
 0x241   : > { %1289 = vst [vmem:[%s257_s12 + $0x8] sm:$0xff] %v1285_v46  ;;  %v1284_v52 = vmax.f32 %v1280_v47, 0.0  ;;  %v1271_v53 = vpop.f32.mrf.mxu0 }
 0x242   : > { %v1283_v55 = vmax.f32 %v1061_v50, %v1277_v51  ;;  %v1272_v56 = vadd.f32 %v1271_v53, %v385_v30 }
 0x243   : > { %1288 = vst [vmem:[%s257_s12] sm:$0xff] %v1284_v52 }
 0x244   : > { %v1287_v57 = vmax.f32 %v1283_v55, 0.0  ;;  %v1282_v58 = vmax.f32 %v1060_v54, %v1272_v56 }
 0x246   : > { %1291 = vst [vmem:[%s257_s12 + $0x18] sm:$0xff] %v1287_v57  ;;  %v1286_v59 = vmax.f32 %v1282_v58, 0.0 }
 0x248   : > { %1290 = vst [vmem:[%s257_s12 + $0x10] sm:$0xff] %v1286_v59 }
 0x249   : > { %1723 = shalt.err (!%p1720_p5)
}
 0x24a   : > { %s1724_s7 = scalar_lea.hbm %s2037_s17, 512  ;;  %s1728_s10 = scalar_lea.hbm %s2091_s5, 1024 }
 0x24b   : > { %p1725_p6 = scmp.ne.s32.totalorder %s2037_s17, %s1724_s7  ;;  %p1729_p10 = scmp.lt.s32.totalorder %s2037_s17, %s2091_s5 }
 0x24c   : > { %p1730_p11 = scmp.lt.s32.totalorder %s1728_s10, %s1724_s7 }
 0x24d   : > { %p1726_p7 = pnand %p1725_p6, %p1866_p4 }
 0x24e   : > { %p1731_p12 = por %p1730_p11, %p1729_p10 }
 0x24f   : > { %p1727_p9 = pneg %p1726_p7 }
 0x251   : > { %p1732_p13 = pnand %p1731_p12, %p1727_p9 }
 0x253   : > { %1735 = shalt.err (!%p1732_p13)
}
 0x254   : > { %s1794_s14 = smov 128   ;;  %s1795_s15 = smov 8  }
 0x255   : > { %1640 = dma.vmem_to_hbm [thread:$0]  (%p1866_p4), %s2032_s13, 512, %s2037_s17, %s2041_s24, %s1794_s14, %s1794_s14, %s1795_s15  }
 0x256 PF: > { %p1646_p0 = scmp.ge.s32.totalorder %s1786_s23, 2  ;;  %s1323_s16 = sand.u32 1, %s1766_s18  }
 0x257   : > { %s1324_s21 = scalar_lea.sflag [#allocation3], %s1323_s16 }
 0x258   : > { %p1643_p1 = pnand %p1646_p0, %p1873_p8 }
 0x25a   : > { %p1644_p2 = pneg %p1643_p1 }
 0x25c   : > { %1761 = dma.done.wait (%p1644_p2), %s1324_s21, 512  }
 0x25d   : > { %1763 = vsyncadd (%p1644_p2), %s1324_s21, 4294966784  ;;  %s18_s23 = sadd.s32 1, %s1786_s23   ;;  %s2094_s18 = smov %s1770_s19 }
 0x25e   : > { %p15_p3 = scmp.ge.s32.totalorder %s18_s23, 4   ;;  %s2095_s19 = smov %s1774_s20 }
 0x25f   : > { %s2096_s20 = smov %s1879_s6  ;;  %s2097_s21 = smov %s1782_s22 }
 0x260   : > { %s2098_s22 = smov %s2100_s26  ;;  %17 = sbr.rel (!%p15_p3) target bundleno = 4 (0x4), region = 79 }
 0x265   :  { %1329 = vsyncpa [#allocation3], 1 }
 0x266   :  { %1331 = vsyncpa [#allocation3 + $0x1], 1 }

</bundles_post_ra>
